<compile_context>
chip_gen: v7x
topology: tpu7x:2x2x1
jax: 0.10.0
libtpu: 0.0.40
codegen_flags: <defaults>
</compile_context>

<pallas_src>
import jax
import jax.numpy as jnp
from jax.experimental import pallas as pl
from jax.experimental.pallas import tpu as pltpu

LANE = 128
_MAX_LANES_PER_STEP = 32768             # absolute cap on BN * tile lanes per grid step
_MAX_BATCH_BLOCK = 16                   # cap on unrolled per-step batch block
_VMEM_BLOCK_BUDGET = 8 * 1024 * 1024    # bytes for double-buffered x/out blocks


def _round_up(x, m):
    return ((x + m - 1) // m) * m


def _largest_divisor_leq(n, cap):
    cap = max(1, min(n, cap))
    for d in range(cap, 0, -1):
        if n % d == 0:
            return d
    return 1


def _conv1x1_kernel(x_ref, w_ref, b_ref, o_ref):
    # x_ref: (BN, Cin, T)   w_ref: (Cout, Cin)   b_ref: (Cout, 1) f32   o_ref: (BN, Cout, T)
    w = w_ref[...]
    b = b_ref[...]
    # BN is a small static block count: unrolled independent 2-D MXU dots
    # (avoids the layout shuffles a batched einsum would introduce).
    for i in range(x_ref.shape[0]):
        y = jnp.dot(w, x_ref[i], preferred_element_type=jnp.float32)   # (Cout, T) f32 accum
        o_ref[i] = (y + b).astype(o_ref.dtype)


def _plan_tiles(N, Cin, Cout, HW, dtype_bytes):
    """Pick (batch block BN, spatial tile T) from a VMEM budget; keep >=2 grid programs."""
    hw_lanes = _round_up(HW, LANE)
    per_lane_bytes = 2 * (Cin + Cout) * dtype_bytes          # double-buffered x + out blocks
    max_lanes = max(LANE, (_VMEM_BLOCK_BUDGET // per_lane_bytes) // LANE * LANE)
    max_lanes = min(max_lanes, _MAX_LANES_PER_STEP)

    if hw_lanes <= max_lanes:
        # Whole spatial row per step: one long contiguous DMA row per channel.
        tile = hw_lanes
        bn_cap = max(1, max_lanes // tile)
        bn_cap = min(bn_cap, _MAX_BATCH_BLOCK)
        if N >= 2:                                           # keep >=2 programs (v7x megacore)
            bn_cap = min(bn_cap, max(1, N // 2))
        bn = _largest_divisor_leq(N, bn_cap)
    else:
        # Big spatial extent: VMEM-budget tile, partial last block handled by Pallas.
        bn = 1
        tile = max_lanes

    # Batch-1 with a single spatial tile: split the spatial axis so both v7x cores get work.
    if N == 1 and tile >= hw_lanes and hw_lanes >= 2 * LANE:
        tile = _round_up((HW + 1) // 2, LANE)
    return bn, tile


def out_conv2d(x_nchw, weight, bias):
    """1x1 Conv2d forward.  x: (N, Cin, H, W) NCHW; weight: (Cout, Cin, 1, 1); bias: (Cout,)."""
    N, Cin, H, W = x_nchw.shape
    Cout, Cin_w, kh, kw = weight.shape
    assert (kh, kw) == (1, 1), "OutConv2D uses a 1x1 convolution kernel"
    assert Cin_w == Cin
    HW = H * W

    dtype_bytes = jnp.dtype(x_nchw.dtype).itemsize
    bn, tile = _plan_tiles(N, Cin, Cout, HW, dtype_bytes)

    # No pad, no trailing slice: partial last spatial block is masked by Pallas.
    xf = x_nchw.reshape(N, Cin, HW)
    w2 = weight.reshape(Cout, Cin).astype(xf.dtype)          # MXU input dtype = activation dtype
    b2 = bias.reshape(Cout, 1).astype(jnp.float32)           # bias added in f32 post-accumulation

    grid = (N // bn, pl.cdiv(HW, tile))

    cost = pl.CostEstimate(
        flops=2 * N * Cout * Cin * HW,
        bytes_accessed=(N * Cin * HW + N * Cout * HW + Cout * Cin + Cout) * dtype_bytes,
        transcendentals=0,
    )

    out_flat = pl.pallas_call(
        _conv1x1_kernel,
        out_shape=jax.ShapeDtypeStruct((N, Cout, HW), x_nchw.dtype),
        grid=grid,
        in_specs=[
            pl.BlockSpec((bn, Cin, tile), lambda n, t: (n, 0, t)),
            pl.BlockSpec((Cout, Cin), lambda n, t: (0, 0)),
            pl.BlockSpec((Cout, 1), lambda n, t: (0, 0)),
        ],
        out_specs=pl.BlockSpec((bn, Cout, tile), lambda n, t: (n, 0, t)),
        compiler_params=pltpu.CompilerParams(
            dimension_semantics=("parallel", "parallel"),
            vmem_limit_bytes=32 * 1024 * 1024),
        cost_estimate=cost,
    )(xf, w2, b2)

    return out_flat.reshape(N, Cout, H, W)


def reference(x_nchw, weight, bias):
    """Pure-JAX reference of the PyTorch forward (1x1 conv)."""
    w2 = weight.reshape(weight.shape[0], weight.shape[1])
    y = jnp.einsum("nchw,oc->nohw", x_nchw, w2)
    return y + bias.reshape(1, -1, 1, 1)


def init_params(key, in_channels, out_channels):
    kw, kb = jax.random.split(key)
    # PyTorch Conv2d weight layout: (Cout, Cin, kH, kW) with kH = kW = 1.
    weight = 0.1 * jax.random.normal(kw, (out_channels, in_channels, 1, 1), jnp.float32)
    bias = 0.1 * jax.random.normal(kb, (out_channels,), jnp.float32)
    return weight, bias


if __name__ == "__main__":
    key = jax.random.PRNGKey(0)
    kx, kp = jax.random.split(key)

    N, Cin, H, W = 2, 4, 16, 16
    Cout = 16
    x = jax.random.normal(kx, (N, Cin, H, W), jnp.float32)   # NCHW like PyTorch
    weight, bias = init_params(kp, Cin, Cout)

    out = out_conv2d(x, weight, bias)
    out = jax.block_until_ready(out)

    ref = jax.block_until_ready(reference(x, weight, bias))
    max_err = float(jnp.max(jnp.abs(out - ref)))
    assert out.shape == (N, Cout, H, W), out.shape
    assert max_err < 1e-4, f"max abs error {max_err}"

    print("KERNEL_OK")
</pallas_src>

<mosaic_0001>
module attributes {stable_mosaic.version = 11 : i64} {
  func.func @_conv1x1_kernel(%arg0: i32, %arg1: i32, %arg2: memref<1x4x256xf32, #tpu.memory_space<vmem>>, %arg3: memref<16x4xf32, #tpu.memory_space<vmem>>, %arg4: memref<16x1xf32, #tpu.memory_space<vmem>>, %arg5: memref<1x16x256xf32, #tpu.memory_space<vmem>>) attributes {dimension_semantics = [#tpu.dimension_semantics<parallel>, #tpu.dimension_semantics<parallel>], iteration_bounds = array<i64: 2, 1>, scalar_prefetch = 0 : i64, scratch_operands = 0 : i64, tpu.core_type = #tpu.core_type<tc>, window_params = [{transform_indices = @transform_0, window_bounds = array<i64: 1, 4, 256>}, {pipeline_mode = #tpu.pipeline_mode<synchronous>, transform_indices = @transform_1, window_bounds = array<i64: 16, 4>}, {pipeline_mode = #tpu.pipeline_mode<synchronous>, transform_indices = @transform_2, window_bounds = array<i64: 16, 1>}, {transform_indices = @transform_3, window_bounds = array<i64: 1, 16, 256>}]} {
    %c0 = arith.constant 0 : index
    %c0_0 = arith.constant 0 : index
    %0 = vector.load %arg3[%c0, %c0_0] : memref<16x4xf32, #tpu.memory_space<vmem>>, vector<16x4xf32>
    %c0_1 = arith.constant 0 : index
    %c0_2 = arith.constant 0 : index
    %1 = vector.load %arg4[%c0_1, %c0_2] : memref<16x1xf32, #tpu.memory_space<vmem>>, vector<16x1xf32>
    %c0_3 = arith.constant 0 : index
    %c0_4 = arith.constant 0 : index
    %c0_5 = arith.constant 0 : index
    %2 = vector.load %arg2[%c0_3, %c0_4, %c0_5] : memref<1x4x256xf32, #tpu.memory_space<vmem>>, vector<1x4x256xf32>
    %3 = vector.shape_cast %2 : vector<1x4x256xf32> to vector<4x256xf32>
    %cst = arith.constant dense<0.000000e+00> : vector<16x256xf32>
    %4 = tpu.matmul %0, %3, %cst {dimension_numbers = #tpu.dot_dimension_numbers<[1], [0], [0], [1], [0, 0, 1, 1], [], []>} : vector<16x4xf32>, vector<4x256xf32>, vector<16x256xf32> -> vector<16x256xf32>
    %5 = vector.broadcast %1 : vector<16x1xf32> to vector<16x256xf32>
    %6 = arith.addf %4, %5 : vector<16x256xf32>
    %c0_6 = arith.constant 0 : index
    %c0_7 = arith.constant 0 : index
    %c0_8 = arith.constant 0 : index
    %7 = vector.load %arg5[%c0_6, %c0_7, %c0_8] : memref<1x16x256xf32, #tpu.memory_space<vmem>>, vector<1x16x256xf32>
    %8 = vector.shape_cast %7 : vector<1x16x256xf32> to vector<16x256xf32>
    %9 = vector.shape_cast %6 : vector<16x256xf32> to vector<1x16x256xf32>
    tpu.vector_store %arg5[%c0_6, %c0_7, %c0_8], %9 {strides = array<i32>} : memref<1x16x256xf32, #tpu.memory_space<vmem>>, vector<1x16x256xf32>,
    return
  }
  func.func @transform_0(%arg0: i32, %arg1: i32) -> (i32, i32, i32) {
    %c0_i32 = arith.constant 0 : i32
    %c0_i32_0 = arith.constant 0 : i32
    return %arg0, %c0_i32, %arg1 : i32, i32, i32
  }
  func.func @transform_1(%arg0: i32, %arg1: i32) -> (i32, i32) {
    %c0_i32 = arith.constant 0 : i32
    %c0_i32_0 = arith.constant 0 : i32
    %c0_i32_1 = arith.constant 0 : i32
    return %c0_i32, %c0_i32_0 : i32, i32
  }
  func.func @transform_2(%arg0: i32, %arg1: i32) -> (i32, i32) {
    %c0_i32 = arith.constant 0 : i32
    %c0_i32_0 = arith.constant 0 : i32
    %c0_i32_1 = arith.constant 0 : i32
    return %c0_i32, %c0_i32_0 : i32, i32
  }
  func.func @transform_3(%arg0: i32, %arg1: i32) -> (i32, i32, i32) {
    %c0_i32 = arith.constant 0 : i32
    %c0_i32_0 = arith.constant 0 : i32
    return %arg0, %c0_i32, %arg1 : i32, i32, i32
  }
}

</mosaic_0001>

<bundles_post_ra>
// kernel: tpu_custom_call.1
= control target key start
LH: loop header
LB: loop body
LE: loop exit
PB: predicated region body
PF: predicated region fallthrough
CT: control target
= control target key end

     0   :  { %8 = vsyncpa [#allocation3], 0  ;;  %s719_s0 = inlined_call_operand.vmem [shape: f32[2,4,256], index: 0, kind: input, shape index: {}]   ;;  %s720_s1 = inlined_call_operand.vmem [shape: f32[16,4], index: 1, kind: input, shape index: {}]   ;;  %s721_s2 = inlined_call_operand.vmem [shape: f32[16,1], index: 2, kind: input, shape index: {}]   ;;  %s722_s3 = inlined_call_operand.hbm [shape: f32[2,16,256], index: 3, kind: output, shape index: {}]  }
   0x1   :  { %10 = vsyncpa [#allocation3 + $0x1], 0  ;;  %s592_s12 = smov 0   ;;  %s594_s13 = smov 0  }
   0x2   :  { %s596_s14 = smov 0   ;;  %s598_s15 = smov 0  }
   0x3   :  { %s600_s16 = smov 0   ;;  %s602_s17 = smov 0  }
   0x4 LB: > { %s405_s18 = sadd.s32 4294967295, %s565_s17   ;;  %s406_s19 = sadd.s32 4294967294, %s565_s17   ;;  %s565_s17 = sphi %s602_s17, %s16_s17   ;;  %s561_s16 = sphi %s600_s16, %s729_s16   ;;  %s557_s15 = sphi %s598_s15, %s728_s15   ;;  %s553_s14 = sphi %s596_s14, %s727_s14   ;;  %s549_s13 = sphi %s594_s13, %s726_s13   ;;  %s545_s12 = sphi %s592_s12, %s725_s12  }
   0x5   : > { %s28_s20 = sadd.s32 1, %s561_s16  ;;  %s107_s21 = sadd.s32 1, %s553_s14 }
   0x6   : > { %p30_p0 = scmp.ge.s32.totalorder %s28_s20, 2  ;;  %p117_p1 = scmp.ne.s32.totalorder %s553_s14, %s549_s13 }
   0x7   : > { %p118_p2 = scmp.eq.s32.totalorder %s405_s18, 1  ;;  %p123_p3 = scmp.ne.s32.totalorder %s549_s13, %s545_s12 }
   0x8   : > { %s731_s20 = smov (%p30_p0, %s28_s20), 0  ;;  %p124_p5 = scmp.eq.s32.totalorder %s406_s19, 1 }
   0x9   : > { %p632_p4 = por %p118_p2, %p117_p1  ;;  %s102_s23 = ssub.s32 %s561_s16, %s731_s20 }
   0xa   : > { %p409_p6 = scmp.ge.s32.totalorder %s565_s17, 1  ;;  %p105_p7 = scmp.eq.s32.totalorder %s102_s23, 0 }
   0xb   : > { %p639_p8 = por %p124_p5, %p123_p3  ;;  %p161_p9 = scmp.lt.s32.totalorder %s565_s17, 3 }
   0xc   : > { %s645_s25 = scalar_select %p105_p7, %s553_s14, %s107_s21  }
   0xd   : > { %p162_p10 = pnand %p409_p6, %p161_p9 }
   0xe   : > { %p190_p11 = scmp.lt.s32.totalorder (!%p162_p10), %s557_s15, 1  ;;  %v567_v0 = vmov (!%p162_p10), 0.0   ;;  %v202_v1 = vld [vmem:[%s721_s2] sm:$0xff] (!%p162_p10)  ;;  %v568_v2 = vmov (!%p162_p10), 0   ;;  %v203_v3 = vld [vmem:[%s721_s2 + $0x8] sm:$0xff] (!%p162_p10)  ;;  %vm224_vm0 = vcmask (!%p162_p10), 1043456  }
   0xf   : > { %165 = sbr.rel (%p162_p10) target bundleno = 261 (0x105), region = 32  ;;  %293 = vmatprep.mubr.f32.mxu0 (!%p162_p10), %v567_v0  ;;  %299 = vmatprep.mubr.f32.mxu1 (!%p162_p10), %v567_v0  ;;  %v200_v6 = vld [vmem:[%s720_s1] sm:$0xff] (!%p162_p10)  ;;  %vm217_vm1 = vcmask (!%p162_p10), 31744   ;;  %v201_v7 = vld [vmem:[%s720_s1 + $0x8] sm:$0xff] (!%p162_p10)  ;;  %s186_s18 = sand.u32 (!%p162_p10), 1, %s549_s13  }
  0x10   : > { %485 = vset.pattern.permute.xlu0 (!%p162_p10), %v568_v2  ;;  %s410_s19 = sshll.u32 (!%p162_p10), %s186_s18, 5  ;;  %s423_s26 = sshll.u32 (!%p162_p10), %s557_s15, 9 }
  0x11   : > { %207 = vperm.xlu0 (!%p162_p10), %485, %v202_v1   ;;  %s188_s21 = scalar_lea.vmem (!%p162_p10), [#allocation2], %s410_s19  ;;  %s569_s4 = smov (!%p162_p10), [#allocation2]  }
  0x12   : > { %s326_s23 = sshll.u32 (!%p162_p10), %s188_s21, 4  ;;  %s491_s5 = sshll.u32 (!%p162_p10), %s569_s4, 4  ;;  %s666_s23 = int_to_ptr.vmem [resolvable:$true] %s326_s23  ;;  %s492_s5 = int_to_ptr.vmem [resolvable:$false] %s491_s5 }
  0x13   : > { %s487_s30 = scalar_lea.vmem (!%p162_p10), %s666_s23, 512  ;;  %s493_s6 = scalar_lea.vmem (!%p162_p10), %s492_s5, 1024 }
  0x14   : > { %p488_p12 = scmp.ne.s32.totalorder (!%p162_p10), %s666_s23, %s487_s30  ;;  %p494_p1 = scmp.lt.s32.totalorder (!%p162_p10), %s666_s23, %s492_s5 }
  0x15   : > { %212 = vperm.xlu0 (!%p162_p10), %485, %v203_v3   ;;  %p495_p2 = scmp.lt.s32.totalorder (!%p162_p10), %s493_s6, %s487_s30 }
  0x16   : > { %s191_s28 = scalar_select %p190_p11, %s557_s15, 1 }
  0x17   : > { %s673_s15 = scalar_lea.sflag [#allocation3], %s186_s18  ;;  %p489_p13 = pnand %p488_p12, %p632_p4 }
  0x18   : > { %s422_s29 = sshll.u32 %s191_s28, 3  ;;  %p496_p3 = por %p495_p2, %p494_p1 }
  0x19   : > { %s197_s7 = scalar_lea.vmem %s719_s0, %s422_s29  ;;  %s671_s29 = scalar_lea.hbm %s722_s3, %s423_s26 }
  0x1a   : > { %v204_v4 = vld [vmem:[%s197_s7] sm:$0xff]  ;;  %p490_p0 = pneg %p489_p13 }
  0x1b   : > { %v216_v5 = vcombine.high %v204_v4, %v204_v4 }
  0x1c   : > { %p497_p5 = pnand %p496_p3, %p490_p0 }
  0x1d   : > { %413 = vmatprep.subr.msk.mxu0 %vm224_vm0, %v216_v5  ;;  %424 = vmatprep.subr.msk.mxu1 %vm224_vm0, %v216_v5 }
  0x1e   : > { %414 = vmatpush1.msk.msra.mxu0 %vm224_vm0, %v204_v4  ;;  %425 = vmatpush1.msk.msra.mxu1 %vm224_vm0, %v204_v4 }
  0x1f   : > { %415 = vmatmul.mubr.msk.f32.vlgmr.msra.gmra.mrb[0].mxu0 %vm217_vm1, %v200_v6  ;;  %416 = vmatmul.mubr.msk.f32.vlgmr.msra.gmra.mrb[0].mxu1 %vm217_vm1, %v201_v7 }
  0x90   : > { %v208_v8 = vpop.permute.xlu0 %207 }
  0x94   : > { %v213_v9 = vpop.permute.xlu0 %212 }
  0xf2   : > { %v295_v10 = vpop.f32.mrb[0].mxu0  ;;  %v301_v11 = vpop.f32.mrb[0].mxu1 }
  0xf3   : > { %v296_v12 = vadd.f32 %v295_v10, %v208_v8  ;;  %v302_v13 = vadd.f32 %v301_v11, %v213_v9  ;;  %v297_v14 = vpop.f32.mrb[1].mxu0  ;;  %v303_v15 = vpop.f32.mrb[1].mxu1 }
  0xf4   : > { %v298_v16 = vadd.f32 %v297_v14, %v208_v8  ;;  %v304_v17 = vadd.f32 %v303_v15, %v213_v9 }
  0xf5   : > { %306 = vst [vmem:[%s188_s21] sm:$0xff] %v296_v12  ;;  %308 = vst [vmem:[%s188_s21 + $0x10] sm:$0xff] %v302_v13 }
  0xf6   : > { %307 = vst [vmem:[%s188_s21 + $0x8] sm:$0xff] %v298_v16  ;;  %309 = vst [vmem:[%s188_s21 + $0x18] sm:$0xff] %v304_v17 }
  0xf7   : > { %500 = shalt.err (!%p497_p5)
}
  0xf8   : > { %s501_s7 = scalar_lea.hbm %s671_s29, 512  ;;  %s505_s10 = scalar_lea.hbm %s722_s3, 1024 }
  0xf9   : > { %p502_p6 = scmp.ne.s32.totalorder %s671_s29, %s501_s7  ;;  %p506_p10 = scmp.lt.u32.totalorder %s671_s29, %s722_s3 }
  0xfa   : > { %p507_p11 = scmp.lt.u32.totalorder %s505_s10, %s501_s7  ;;  %p509_p13 = scmp.lt.u32.totalorder %s501_s7, %s671_s29 }
  0xfb   : > { %p503_p7 = pnand %p502_p6, %p632_p4 }
  0xfc   : > { %p508_p12 = por %p507_p11, %p506_p10 }
  0xfd   : > { %p504_p9 = pneg %p503_p7 }
  0xfe   : > { %p510_p0 = por %p509_p13, %p508_p12 }
 0x100   : > { %p511_p1 = pnand %p510_p0, %p504_p9 }
 0x102   : > { %514 = shalt.err (!%p511_p1)
}
 0x103   : > { %s570_s19 = smov 256   ;;  %s571_s21 = smov 16  }
 0x104   : > { %426 = dma.vmem_to_hbm [thread:$0]  (%p632_p4), %s666_s23, 512, %s671_s29, %s673_s15, %s570_s19, %s570_s19, %s571_s21  }
 0x105 PF: > { %p432_p2 = scmp.ge.s32.totalorder %s565_s17, 2  ;;  %s341_s26 = sand.u32 1, %s545_s12  }
 0x106   : > { %s342_s27 = scalar_lea.sflag [#allocation3], %s341_s26 }
 0x107   : > { %p429_p3 = pnand %p432_p2, %p639_p8 }
 0x109   : > { %540 = dma.done.wait (!%p429_p3), %s342_s27, 512  }
 0x10a   : > { %542 = vsyncadd (!%p429_p3), %s342_s27, 4294966784  ;;  %s16_s17 = sadd.s32 1, %s565_s17   ;;  %s725_s12 = smov %s549_s13 }
 0x10b   : > { %p13_p5 = scmp.ge.s32.totalorder %s16_s17, 4   ;;  %s726_s13 = smov %s553_s14 }
 0x10c   : > { %s727_s14 = smov %s645_s25  ;;  %s728_s15 = smov %s561_s16 }
 0x10d   : > { %s729_s16 = smov %s731_s20  ;;  %15 = sbr.rel (!%p13_p5) target bundleno = 4 (0x4), region = 67 }
 0x114   :  { %347 = vsyncpa [#allocation3], 1 }
 0x115   :  { %349 = vsyncpa [#allocation3 + $0x1], 1 }

</bundles_post_ra>
